<compile_context>
chip_gen: v6e
topology: v6e:2x2x1
jax: 0.10.0
libtpu: 0.0.40
codegen_flags: <defaults>
</compile_context>

<pallas_src>
import jax
import jax.numpy as jnp
from jax.experimental import pallas as pl
from jax.experimental.pallas import tpu as pltpu


def _elu(x):
    # ELU with alpha=1: x if x > 0 else exp(x) - 1
    return jnp.where(x > 0, x, jnp.exp(jnp.minimum(x, 0.0)) - 1.0)


def decoder_u_kernel(h_ref, w1_ref, b1_ref, w2_ref, b2_ref, w3_ref, b3_ref, out_ref):
    h = h_ref[...]                                        # (TB, L) f32

    # Layer 1: (TB, L) @ (L, H) + (1, H), ELU
    a1 = jnp.dot(h, w1_ref[...], preferred_element_type=jnp.float32) + b1_ref[...]
    a1 = _elu(a1)

    # Layer 2: (TB, H) @ (H, H) + (1, H), ELU
    a2 = jnp.dot(a1, w2_ref[...], preferred_element_type=jnp.float32) + b2_ref[...]
    a2 = _elu(a2)

    # Layer 3 (no activation). w3/b3 are pre-padded with 2 leading zero
    # columns, so this directly yields the F.pad(..., (2, 0)) result.
    out_ref[...] = (
        jnp.dot(a2, w3_ref[...], preferred_element_type=jnp.float32) + b3_ref[...]
    )


def _round_up(x, m):
    return (x + m - 1) // m * m


def decoder_u_forward(u_lat, params, *, block_b=512):
    """u_lat: (B, latent_size) f32. Returns (B, num_nodes, 2) f32."""
    B, L = u_lat.shape
    H = params["w1"].shape[1]
    O = params["w3"].shape[1]           # (num_nodes - 1) * 2
    Opad = O + 2                        # num_nodes * 2 (after the left pad)
    num_nodes = Opad // 2

    w1 = params["w1"]
    b1 = params["b1"].reshape(1, H)
    w2 = params["w2"]
    b2 = params["b2"].reshape(1, H)
    # Fold F.pad(..., (2, 0)) into the last layer: zero first two output cols.
    w3 = jnp.pad(params["w3"], ((0, 0), (2, 0)))          # (H, Opad)
    b3 = jnp.pad(params["b3"], ((2, 0),)).reshape(1, Opad)

    # Batch tile: multiple of 8 (sublanes); pad B up so the grid is exact.
    tb = min(int(block_b), _round_up(B, 8))
    tb = _round_up(tb, 8)
    Bp = _round_up(B, tb)
    h = u_lat.astype(jnp.float32)
    if Bp != B:
        h = jnp.pad(h, ((0, Bp - B), (0, 0)))

    grid = (Bp // tb,)
    const = lambda shape: pl.BlockSpec(shape, lambda i: (0, 0))  # resident block

    out_flat = pl.pallas_call(
        decoder_u_kernel,
        out_shape=jax.ShapeDtypeStruct((Bp, Opad), jnp.float32),
        grid=grid,
        in_specs=[
            pl.BlockSpec((tb, L), lambda i: (i, 0)),   # streamed activations
            const((L, H)), const((1, H)),              # layer 1 (resident)
            const((H, H)), const((1, H)),              # layer 2 (resident)
            const((H, Opad)), const((1, Opad)),        # layer 3 (resident)
        ],
        out_specs=pl.BlockSpec((tb, Opad), lambda i: (i, 0)),
        compiler_params=pltpu.CompilerParams(
            dimension_semantics=("parallel",),         # both TCs on v7x
            vmem_limit_bytes=32 * 1024 * 1024,         # ample headroom, safe on all gens
        ),
    )(h, w1, b1, w2, b2, w3, b3)

    return out_flat[:B].reshape(B, num_nodes, 2)


def init_params(key, num_nodes, latent_size, hidden_size):
    """Mimics PyTorch's default nn.Linear init: U(-1/sqrt(fan_in), 1/sqrt(fan_in))."""
    out_size = (num_nodes - 1) * 2
    ks = jax.random.split(key, 6)

    def lin(kw, kb, fan_in, fan_out):
        bound = 1.0 / jnp.sqrt(fan_in)
        w = jax.random.uniform(kw, (fan_in, fan_out), jnp.float32, -bound, bound)
        b = jax.random.uniform(kb, (fan_out,), jnp.float32, -bound, bound)
        return w, b

    w1, b1 = lin(ks[0], ks[1], latent_size, hidden_size)
    w2, b2 = lin(ks[2], ks[3], hidden_size, hidden_size)
    w3, b3 = lin(ks[4], ks[5], hidden_size, out_size)
    return dict(w1=w1, b1=b1, w2=w2, b2=b2, w3=w3, b3=b3)


def decoder_u_reference(u_lat, params):
    a = _elu(u_lat @ params["w1"] + params["b1"])
    a = _elu(a @ params["w2"] + params["b2"])
    a = a @ params["w3"] + params["b3"]
    a = jnp.pad(a, ((0, 0), (2, 0)))                       # F.pad(..., (2, 0))
    B = u_lat.shape[0]
    return a.reshape(B, a.shape[-1] // 2, 2)


if __name__ == "__main__":
    num_nodes = 16
    latent_size = 16
    hidden_size = 32
    batch = 64

    key = jax.random.PRNGKey(0)
    k_param, k_h, k_h2 = jax.random.split(key, 3)
    params = init_params(k_param, num_nodes, latent_size, hidden_size)
    u_lat = jax.random.normal(k_h, (batch, latent_size), jnp.float32)

    # Small block so the test actually exercises a multi-step batch grid.
    out = decoder_u_forward(u_lat, params, block_b=16)
    out = jax.block_until_ready(out)
    ref = decoder_u_reference(u_lat, params)
    assert out.shape == (batch, num_nodes, 2), out.shape
    assert jnp.allclose(out, ref, atol=1e-5, rtol=1e-5), (out, ref)

    # Ragged batch (B not a multiple of the block): pad-and-slice path.
    u_lat2 = jax.random.normal(k_h2, (10, latent_size), jnp.float32)
    out2 = jax.block_until_ready(decoder_u_forward(u_lat2, params, block_b=16))
    ref2 = decoder_u_reference(u_lat2, params)
    assert out2.shape == (10, num_nodes, 2), out2.shape
    assert jnp.allclose(out2, ref2, atol=1e-5, rtol=1e-5), (out2, ref2)

    print("KERNEL_OK")
</pallas_src>

<mosaic_0001>
module attributes {stable_mosaic.version = 11 : i64} {
  func.func @decoder_u_kernel(%arg0: i32, %arg1: memref<16x16xf32, #tpu.memory_space<vmem>>, %arg2: memref<16x32xf32, #tpu.memory_space<vmem>>, %arg3: memref<1x32xf32, #tpu.memory_space<vmem>>, %arg4: memref<32x32xf32, #tpu.memory_space<vmem>>, %arg5: memref<1x32xf32, #tpu.memory_space<vmem>>, %arg6: memref<32x32xf32, #tpu.memory_space<vmem>>, %arg7: memref<1x32xf32, #tpu.memory_space<vmem>>, %arg8: memref<16x32xf32, #tpu.memory_space<vmem>>) attributes {dimension_semantics = [#tpu.dimension_semantics<parallel>], iteration_bounds = array<i64: 4>, scalar_prefetch = 0 : i64, scratch_operands = 0 : i64, tpu.core_type = #tpu.core_type<tc>, window_params = [{transform_indices = @transform_0, window_bounds = array<i64: 16, 16>}, {pipeline_mode = #tpu.pipeline_mode<synchronous>, transform_indices = @transform_1, window_bounds = array<i64: 16, 32>}, {pipeline_mode = #tpu.pipeline_mode<synchronous>, transform_indices = @transform_2, window_bounds = array<i64: 1, 32>}, {pipeline_mode = #tpu.pipeline_mode<synchronous>, transform_indices = @transform_3, window_bounds = array<i64: 32, 32>}, {pipeline_mode = #tpu.pipeline_mode<synchronous>, transform_indices = @transform_4, window_bounds = array<i64: 1, 32>}, {pipeline_mode = #tpu.pipeline_mode<synchronous>, transform_indices = @transform_5, window_bounds = array<i64: 32, 32>}, {pipeline_mode = #tpu.pipeline_mode<synchronous>, transform_indices = @transform_6, window_bounds = array<i64: 1, 32>}, {transform_indices = @transform_7, window_bounds = array<i64: 16, 32>}]} {
    %c0 = arith.constant 0 : index
    %c0_0 = arith.constant 0 : index
    %0 = vector.load %arg1[%c0, %c0_0] : memref<16x16xf32, #tpu.memory_space<vmem>>, vector<16x16xf32>
    %c0_1 = arith.constant 0 : index
    %c0_2 = arith.constant 0 : index
    %1 = vector.load %arg2[%c0_1, %c0_2] : memref<16x32xf32, #tpu.memory_space<vmem>>, vector<16x32xf32>
    %cst = arith.constant dense<0.000000e+00> : vector<16x32xf32>
    %2 = tpu.matmul %0, %1, %cst {dimension_numbers = #tpu.dot_dimension_numbers<[1], [0], [0], [1], [0, 0, 1, 1], [], []>} : vector<16x16xf32>, vector<16x32xf32>, vector<16x32xf32> -> vector<16x32xf32>
    %c0_3 = arith.constant 0 : index
    %c0_4 = arith.constant 0 : index
    %3 = vector.load %arg3[%c0_3, %c0_4] : memref<1x32xf32, #tpu.memory_space<vmem>>, vector<1x32xf32>
    %4 = vector.broadcast %3 : vector<1x32xf32> to vector<16x32xf32>
    %5 = arith.addf %2, %4 : vector<16x32xf32>
    %cst_5 = arith.constant 0.000000e+00 : f32
    %6 = vector.broadcast %cst_5 : f32 to vector<16x32xf32>
    %7 = arith.cmpf ogt, %5, %6 : vector<16x32xf32>
    %cst_6 = arith.constant 0.000000e+00 : f32
    %8 = vector.broadcast %cst_6 : f32 to vector<16x32xf32>
    %9 = arith.minimumf %5, %8 : vector<16x32xf32>
    %10 = math.exp %9 : vector<16x32xf32>
    %cst_7 = arith.constant 1.000000e+00 : f32
    %11 = vector.broadcast %cst_7 : f32 to vector<16x32xf32>
    %12 = arith.subf %10, %11 : vector<16x32xf32>
    %13 = arith.select %7, %5, %12 : vector<16x32xi1>, vector<16x32xf32>
    %c0_8 = arith.constant 0 : index
    %c0_9 = arith.constant 0 : index
    %14 = vector.load %arg4[%c0_8, %c0_9] : memref<32x32xf32, #tpu.memory_space<vmem>>, vector<32x32xf32>
    %cst_10 = arith.constant dense<0.000000e+00> : vector<16x32xf32>
    %15 = tpu.matmul %13, %14, %cst_10 {dimension_numbers = #tpu.dot_dimension_numbers<[1], [0], [0], [1], [0, 0, 1, 1], [], []>} : vector<16x32xf32>, vector<32x32xf32>, vector<16x32xf32> -> vector<16x32xf32>
    %c0_11 = arith.constant 0 : index
    %c0_12 = arith.constant 0 : index
    %16 = vector.load %arg5[%c0_11, %c0_12] : memref<1x32xf32, #tpu.memory_space<vmem>>, vector<1x32xf32>
    %17 = vector.broadcast %16 : vector<1x32xf32> to vector<16x32xf32>
    %18 = arith.addf %15, %17 : vector<16x32xf32>
    %cst_13 = arith.constant 0.000000e+00 : f32
    %19 = vector.broadcast %cst_13 : f32 to vector<16x32xf32>
    %20 = arith.cmpf ogt, %18, %19 : vector<16x32xf32>
    %cst_14 = arith.constant 0.000000e+00 : f32
    %21 = vector.broadcast %cst_14 : f32 to vector<16x32xf32>
    %22 = arith.minimumf %18, %21 : vector<16x32xf32>
    %23 = math.exp %22 : vector<16x32xf32>
    %cst_15 = arith.constant 1.000000e+00 : f32
    %24 = vector.broadcast %cst_15 : f32 to vector<16x32xf32>
    %25 = arith.subf %23, %24 : vector<16x32xf32>
    %26 = arith.select %20, %18, %25 : vector<16x32xi1>, vector<16x32xf32>
    %c0_16 = arith.constant 0 : index
    %c0_17 = arith.constant 0 : index
    %27 = vector.load %arg6[%c0_16, %c0_17] : memref<32x32xf32, #tpu.memory_space<vmem>>, vector<32x32xf32>
    %cst_18 = arith.constant dense<0.000000e+00> : vector<16x32xf32>
    %28 = tpu.matmul %26, %27, %cst_18 {dimension_numbers = #tpu.dot_dimension_numbers<[1], [0], [0], [1], [0, 0, 1, 1], [], []>} : vector<16x32xf32>, vector<32x32xf32>, vector<16x32xf32> -> vector<16x32xf32>
    %c0_19 = arith.constant 0 : index
    %c0_20 = arith.constant 0 : index
    %29 = vector.load %arg7[%c0_19, %c0_20] : memref<1x32xf32, #tpu.memory_space<vmem>>, vector<1x32xf32>
    %30 = vector.broadcast %29 : vector<1x32xf32> to vector<16x32xf32>
    %31 = arith.addf %28, %30 : vector<16x32xf32>
    %c0_21 = arith.constant 0 : index
    %c0_22 = arith.constant 0 : index
    %32 = vector.load %arg8[%c0_21, %c0_22] : memref<16x32xf32, #tpu.memory_space<vmem>>, vector<16x32xf32>
    tpu.vector_store %arg8[%c0_21, %c0_22], %31 {strides = array<i32>} : memref<16x32xf32, #tpu.memory_space<vmem>>, vector<16x32xf32>,
    return
  }
  func.func @transform_0(%arg0: i32) -> (i32, i32) {
    %c0_i32 = arith.constant 0 : i32
    %c0_i32_0 = arith.constant 0 : i32
    return %arg0, %c0_i32 : i32, i32
  }
  func.func @transform_1(%arg0: i32) -> (i32, i32) {
    %c0_i32 = arith.constant 0 : i32
    %c0_i32_0 = arith.constant 0 : i32
    %c0_i32_1 = arith.constant 0 : i32
    return %c0_i32, %c0_i32_0 : i32, i32
  }
  func.func @transform_2(%arg0: i32) -> (i32, i32) {
    %c0_i32 = arith.constant 0 : i32
    %c0_i32_0 = arith.constant 0 : i32
    %c0_i32_1 = arith.constant 0 : i32
    return %c0_i32, %c0_i32_0 : i32, i32
  }
  func.func @transform_3(%arg0: i32) -> (i32, i32) {
    %c0_i32 = arith.constant 0 : i32
    %c0_i32_0 = arith.constant 0 : i32
    %c0_i32_1 = arith.constant 0 : i32
    return %c0_i32, %c0_i32_0 : i32, i32
  }
  func.func @transform_4(%arg0: i32) -> (i32, i32) {
    %c0_i32 = arith.constant 0 : i32
    %c0_i32_0 = arith.constant 0 : i32
    %c0_i32_1 = arith.constant 0 : i32
    return %c0_i32, %c0_i32_0 : i32, i32
  }
  func.func @transform_5(%arg0: i32) -> (i32, i32) {
    %c0_i32 = arith.constant 0 : i32
    %c0_i32_0 = arith.constant 0 : i32
    %c0_i32_1 = arith.constant 0 : i32
    return %c0_i32, %c0_i32_0 : i32, i32
  }
  func.func @transform_6(%arg0: i32) -> (i32, i32) {
    %c0_i32 = arith.constant 0 : i32
    %c0_i32_0 = arith.constant 0 : i32
    %c0_i32_1 = arith.constant 0 : i32
    return %c0_i32, %c0_i32_0 : i32, i32
  }
  func.func @transform_7(%arg0: i32) -> (i32, i32) {
    %c0_i32 = arith.constant 0 : i32
    %c0_i32_0 = arith.constant 0 : i32
    return %arg0, %c0_i32 : i32, i32
  }
}

</mosaic_0001>

<bundles_post_ra>
// kernel: tpu_custom_call.1
= control target key start
LH: loop header
LB: loop body
LE: loop exit
PB: predicated region body
PF: predicated region fallthrough
CT: control target
= control target key end

     0   :  { %s775_s24 = smov 0   ;;  %s844_s0 = inlined_call_operand.vmem [shape: f32[64,16], index: 0, kind: input, shape index: {}]   ;;  %s845_s1 = inlined_call_operand.vmem [shape: f32[16,32], index: 1, kind: input, shape index: {}]   ;;  %s846_s2 = inlined_call_operand.vmem [shape: f32[1,32], index: 2, kind: input, shape index: {}]   ;;  %s847_s3 = inlined_call_operand.vmem [shape: f32[32,32], index: 3, kind: input, shape index: {}]   ;;  %s848_s4 = inlined_call_operand.vmem [shape: f32[1,32], index: 4, kind: input, shape index: {}]   ;;  %s849_s5 = inlined_call_operand.vmem [shape: f32[32,32], index: 5, kind: input, shape index: {}]   ;;  %s850_s6 = inlined_call_operand.vmem [shape: f32[1,32], index: 6, kind: input, shape index: {}]   ;;  %s851_s7 = inlined_call_operand.vmem [shape: f32[64,32], index: 7, kind: output, shape index: {}]  }
   0x1 LB: > { %s642_s25 = sadd.s32 4294967295, %s733_s24   ;;  %p646_p0 = scmp.ge.s32.totalorder %s733_s24, 1  ;;  %s733_s24 = sphi %s775_s24, %s17_s24  }
   0x2   : > { %p238_p1 = scmp.lt.s32.totalorder %s733_s24, 5 }
   0x4   : > { %p239_p2 = pnand %p646_p0, %p238_p1 }
   0x5   : > { %s647_s30 = sshll.u32 (!%p239_p2), %s642_s25, 1 }
   0x6   : > { %242 = sbr.rel (%p239_p2) target bundleno = 652 (0x28c), region = 48  ;;  %p271_p3 = scmp.lt.s32.totalorder (!%p239_p2), %s647_s30, 7 }
   0xb   : > { %v285_v0 = vld [vmem:[%s845_s1 + $0x8] sm:$0xff]  ;;  %v284_v1 = vld [vmem:[%s845_s1] sm:$0xff]  ;;  %s853_s30 = smov (!%p271_p3, %s647_s30), 7  ;;  %vm293_vm0 = vcmask 130048   ;;  %v390_v4 = vld [vmem:[%s847_s3 + $0x18] sm:$0xff]  ;;  %vm398_vm1 = vcmask 261120  }
   0xc   : > { %682 = vmatprep.subr.mxu0 %v285_v0  ;;  %s648_s8 = sshll.u32 %s853_s30, 3  ;;  %v389_v5 = vld [vmem:[%s847_s3 + $0x10] sm:$0xff]  ;;  %689 = vmatprep.subr.mxu1 %v390_v4  ;;  %v388_v6 = vld [vmem:[%s847_s3 + $0x8] sm:$0xff]  ;;  %v387_v7 = vld [vmem:[%s847_s3] sm:$0xff] }
   0xd   : > { %683 = vmatpush3.msra.mxu0 %v285_v0  ;;  %s274_s11 = scalar_lea.vmem %s844_s0, %s648_s8  ;;  %690 = vmatpush3.msra.mxu1 %v390_v4  ;;  %v651_v8 = vld [vmem:[%s846_s2] ss:$0 sm:$0xff]  ;;  %v495_v23 = vld [vmem:[%s849_s5 + $0x18] sm:$0xff]  ;;  %v494_v24 = vld [vmem:[%s849_s5 + $0x10] sm:$0xff]  ;;  %s280_s16 = scalar_lea.vmem %s851_s7, %s648_s8 }
   0xe   : > { %684 = vmatprep.subr.mxu0 %v284_v1  ;;  %v282_v2 = vld [vmem:[%s274_s11] sm:$0xff]  ;;  %v283_v3 = vld [vmem:[%s274_s11 + $0x8] sm:$0xff]  ;;  %691 = vmatprep.subr.mxu1 %v389_v5 }
   0xf   : > { %685 = vmatpush3.msra.mxu0 %v284_v1  ;;  %686 = vmatprep.mubr.msk.f32.mxu0 %vm293_vm0, %v282_v2  ;;  %v493_v25 = vld [vmem:[%s849_s5 + $0x8] sm:$0xff]  ;;  %v492_v26 = vld [vmem:[%s849_s5] sm:$0xff] }
  0x10   : > { %687 = vmatmul.mubr.msk.f32.vlgmr.msra.gmra.mxu0 %vm293_vm0, %v283_v3  ;;  %692 = vmatpush3.msra.mxu1 %v389_v5  ;;  %v656_v27 = vld [vmem:[%s848_s4] ss:$0 sm:$0xff] }
  0x11   : > { %693 = vmatprep.subr.mxu1 %v388_v6  ;;  %700 = vmatprep.subr.mxu0 %v495_v23  ;;  %v661_v43 = vld [vmem:[%s850_s6] ss:$0 sm:$0xff] }
  0x12   : > { %694 = vmatpush3.msra.mxu1 %v388_v6  ;;  %701 = vmatpush3.msra.mxu0 %v495_v23 }
  0x13   : > { %695 = vmatprep.subr.mxu1 %v387_v7  ;;  %702 = vmatprep.subr.mxu0 %v494_v24 }
  0x14   : > { %696 = vmatpush3.msra.mxu1 %v387_v7  ;;  %703 = vmatpush3.msra.mxu0 %v494_v24 }
  0x15   : > { %704 = vmatprep.subr.mxu0 %v493_v25 }
  0x16   : > { %705 = vmatpush3.msra.mxu0 %v493_v25 }
  0x17   : > { %706 = vmatprep.subr.mxu0 %v492_v26 }
  0x18   : > { %707 = vmatpush3.msra.mxu0 %v492_v26 }
  0xd0   : > { %v688_v9 = vpop.f32.mrf.mxu0 }
  0xd1   : > { %v372_v10 = vadd.f32 %v688_v9, %v651_v8 }
  0xd2   : > { %v366_v11 = vpop.f32.mrf.mxu0 }
  0xd3   : > { %v378_v12 = vmin.f32 %v372_v10, 0.0  ;;  %v367_v13 = vadd.f32 %v651_v8, %v366_v11  ;;  %vm376_vm3 = vcmp.gt.f32.partialorder %v372_v10, 0.0 }
  0xd5   : > { %v381_v14 = vmul.f32 1.442695, %v378_v12  ;;  %v377_v15 = vmin.f32 %v367_v13, 0.0  ;;  %vm375_vm2 = vcmp.gt.f32.partialorder %v367_v13, 0.0 }
  0xd7   : > { %719 = vpow2.f32 %v381_v14  ;;  %v379_v16 = vmul.f32 1.442695, %v377_v15 }
  0xd9   : > { %721 = vpow2.f32 %v379_v16 }
  0xe4   : > { %v720_v17 = vpop.eup %719 }
  0xe5   : > { %v655_v19 = vadd.f32 -1.0, %v720_v17 }
  0xe6   : > { %v722_v18 = vpop.eup %721 }
  0xe7   : > { %v654_v20 = vadd.f32 -1.0, %v722_v18  ;;  %v386_v22 = vsel %vm376_vm3, %v372_v10, %v655_v19 }
  0xe9   : > { %v385_v21 = vsel %vm375_vm2, %v367_v13, %v654_v20 }
  0xea   : > { %697 = vmatprep.mubr.msk.f32.mxu1 %vm398_vm1, %v385_v21 }
  0xeb   : > { %698 = vmatmul.mubr.msk.f32.vlgmr.msra.gmra.mxu1 %vm398_vm1, %v386_v22 }
 0x1ab   : > { %v699_v28 = vpop.f32.mrf.mxu1 }
 0x1ac   : > { %v477_v29 = vadd.f32 %v699_v28, %v656_v27 }
 0x1ad   : > { %v471_v30 = vpop.f32.mrf.mxu1 }
 0x1ae   : > { %v483_v31 = vmin.f32 %v477_v29, 0.0  ;;  %v472_v32 = vadd.f32 %v656_v27, %v471_v30  ;;  %vm481_vm5 = vcmp.gt.f32.partialorder %v477_v29, 0.0 }
 0x1b0   : > { %v486_v33 = vmul.f32 1.442695, %v483_v31  ;;  %v482_v34 = vmin.f32 %v472_v32, 0.0  ;;  %vm480_vm4 = vcmp.gt.f32.partialorder %v472_v32, 0.0 }
 0x1b2   : > { %723 = vpow2.f32 %v486_v33  ;;  %v484_v35 = vmul.f32 1.442695, %v482_v34 }
 0x1b4   : > { %725 = vpow2.f32 %v484_v35 }
 0x1bf   : > { %v724_v36 = vpop.eup %723 }
 0x1c0   : > { %v660_v38 = vadd.f32 -1.0, %v724_v36 }
 0x1c1   : > { %v726_v37 = vpop.eup %725 }
 0x1c2   : > { %v659_v39 = vadd.f32 -1.0, %v726_v37  ;;  %v491_v41 = vsel %vm481_vm5, %v477_v29, %v660_v38 }
 0x1c4   : > { %v490_v40 = vsel %vm480_vm4, %v472_v32, %v659_v39 }
 0x1c5   : > { %708 = vmatprep.mubr.msk.f32.mxu0 %vm398_vm1, %v490_v40 }
 0x1c6   : > { %709 = vmatmul.mubr.msk.f32.vlgmr.msra.gmra.mxu0 %vm398_vm1, %v491_v41 }
 0x286   : > { %v710_v42 = vpop.f32.mrf.mxu0 }
 0x287   : > { %v581_v46 = vadd.f32 %v710_v42, %v661_v43 }
 0x288   : > { %v575_v44 = vpop.f32.mrf.mxu0 }
 0x289   : > { %v576_v45 = vadd.f32 %v661_v43, %v575_v44  ;;  %585 = vst.msk [vmem:[%s280_s16 + $0x8] sm:$0xff] %vm398_vm1, %v581_v46 }
 0x28b   : > { %584 = vst.msk [vmem:[%s280_s16] sm:$0xff] %vm398_vm1, %v576_v45 }
 0x28c PF: > { %s17_s24 = sadd.s32 1, %s733_s24  }
 0x28d   : > { %p14_p4 = scmp.ge.s32.totalorder %s17_s24, 6  }
 0x28f   :  { %16 = sbr.rel (!%p14_p4) target bundleno = 1 (0x1), region = 78 }

</bundles_post_ra>
